<compile_context>
chip_gen: v5e
topology: v5e:2x2
jax: 0.10.0
libtpu: 0.0.40
codegen_flags: <defaults>
</compile_context>

<pallas_src>
import functools

import jax
import jax.numpy as jnp
import numpy as np
from jax.experimental import pallas as pl
from jax.experimental.pallas import tpu as pltpu


# --------------------------------------------------------------------------
# Packed weight-slab layout (lane width = 4H; all offsets are static Python ints)
# --------------------------------------------------------------------------
def _slab_offsets(E, H, NT):
    off = {}
    off["ih"] = 0                    # (E , 4H)  live rows of LSTM w_ih
    off["hh"] = off["ih"] + E        # (H , 4H)  LSTM w_hh
    off["st"] = off["hh"] + H        # (H , 2H)  [w_nl[:H] | w_attn[:H]]   (st -> zt, st -> ct)
    off["zt"] = off["st"] + H        # (H , 2H)  [w_env[:H]| w_attn[H:2H]] (zt -> et, zt -> ct)
    off["nl"] = off["zt"] + H        # (H , H )  w_nl[H:2H]   (nl -> zt)
    off["env"] = off["nl"] + H       # (H , H )  w_env[H:2H]  (env -> et)
    off["et"] = off["env"] + H       # (H , H )  w_attn[2H:3H](et -> ct)
    off["out"] = off["et"] + H       # (H , R+1) [w_ct | w_copy]
    off["bias"] = off["out"] + H     # 5 bias rows
    off["emb"] = off["bias"] + 5     # (NT, E)   nt_embedding table
    rows = off["emb"] + NT
    off["rows"] = ((rows + 7) // 8) * 8
    return off


def pack_params(params):
    """One-time packing of every DecoderOne parameter into a single f32 slab.

    Runs once at init -> zero per-forward packing HLOs (perf-review item 1/4).
    Returns (slab, (E, H, R, NT)).
    """
    nt_emb = params["nt_embedding"]
    NT, E = nt_emb.shape
    H = params["w_hh"].shape[0]
    R = params["w_ct"].shape[1]
    L = 4 * H
    assert E <= L and 2 * H <= L and R + 1 <= L
    off = _slab_offsets(E, H, NT)
    w_nl, w_env, w_attn = params["w_nl"], params["w_env"], params["w_attn"]

    slab = jnp.zeros((off["rows"], L), jnp.float32)
    slab = slab.at[off["ih"]:off["ih"] + E, :].set(params["w_ih"][:E, :])
    slab = slab.at[off["hh"]:off["hh"] + H, :].set(params["w_hh"])
    # Lane-pack RHS blocks that share an LHS -> one dot each for st and zt.
    slab = slab.at[off["st"]:off["st"] + H, 0:2 * H].set(
        jnp.concatenate([w_nl[:H], w_attn[:H]], axis=1))
    slab = slab.at[off["zt"]:off["zt"] + H, 0:2 * H].set(
        jnp.concatenate([w_env[:H], w_attn[H:2 * H]], axis=1))
    slab = slab.at[off["nl"]:off["nl"] + H, 0:H].set(w_nl[H:2 * H])
    slab = slab.at[off["env"]:off["env"] + H, 0:H].set(w_env[H:2 * H])
    slab = slab.at[off["et"]:off["et"] + H, 0:H].set(w_attn[2 * H:3 * H])
    slab = slab.at[off["out"]:off["out"] + H, 0:R + 1].set(
        jnp.concatenate([params["w_ct"], params["w_copy"]], axis=1))
    # Real PyTorch mapping: the LSTM bias folded into x_proj is b_ih + b_hh.
    slab = slab.at[off["bias"] + 0, :].set((params["b_ih"] + params["b_hh"])[0])
    slab = slab.at[off["bias"] + 1, 0:H].set(params["b_nl"][0])
    slab = slab.at[off["bias"] + 2, 0:H].set(params["b_env"][0])
    slab = slab.at[off["bias"] + 3, 0:H].set(params["b_attn"][0])
    slab = slab.at[off["bias"] + 4, 0:R].set(params["b_ct"][0])
    slab = slab.at[off["bias"] + 4, R].set(params["b_copy"][0, 0])
    slab = slab.at[off["emb"]:off["emb"] + NT, 0:E].set(nt_emb)
    return slab, (E, H, R, NT)


# --------------------------------------------------------------------------
# Kernel
# --------------------------------------------------------------------------
def _build_kernel(T, E, H, R, NT):
    off = _slab_offsets(E, H, NT)
    o_ih, o_hh = off["ih"], off["hh"]
    o_st, o_zt, o_nl, o_env, o_et = off["st"], off["zt"], off["nl"], off["env"], off["et"]
    o_out, o_bias, o_emb = off["out"], off["bias"], off["emb"]

    def kernel(idx_ref, w_ref, nl_ref, env_ref, out_ref):
        # ---- embedding gather in-kernel (indices live in SMEM) ------------
        emb = jnp.concatenate(
            [w_ref[pl.ds(o_emb + idx_ref[t], 1), 0:E] for t in range(T)],
            axis=0)                                                      # (T, E)

        # ---- everything independent of the recurrence, issued up front ----
        x_proj = (jnp.dot(emb, w_ref[o_ih:o_ih + E, :],
                          preferred_element_type=jnp.float32)
                  + w_ref[o_bias:o_bias + 1, :])                         # (T, 4H), b_ih+b_hh folded
        nl = nl_ref[...]
        env = env_ref[...]
        nl_proj = jnp.dot(nl, w_ref[o_nl:o_nl + H, 0:H],
                          preferred_element_type=jnp.float32)            # (T, H)
        env_proj = jnp.dot(env, w_ref[o_env:o_env + H, 0:H],
                           preferred_element_type=jnp.float32)           # (T, H)

        # ---- LSTM recurrence (seq_len = T, batch = 1, h0 = c0 = 0) --------
        w_hh = w_ref[o_hh:o_hh + H, :]                                   # hoisted load
        h = jnp.zeros((1, H), jnp.float32)
        c = jnp.zeros((1, H), jnp.float32)
        h_rows = []
        for t in range(T):            # small compile-time T -> static unroll
            g = x_proj[t:t + 1, :] + jnp.dot(h, w_hh,
                                             preferred_element_type=jnp.float32)
            # NOTE: 4 narrow EUP calls per step; the "2 full-row EUP calls"
            # variant from the review is optional/measure-first, left as-is.
            i_g = jax.nn.sigmoid(g[:, 0 * H:1 * H])
            f_g = jax.nn.sigmoid(g[:, 1 * H:2 * H])
            g_g = jnp.tanh(g[:, 2 * H:3 * H])
            o_g = jax.nn.sigmoid(g[:, 3 * H:4 * H])
            c = f_g * c + i_g * g_g
            h = o_g * jnp.tanh(c)
            h_rows.append(h)
        st = jnp.concatenate(h_rows, axis=0)   # one sublane stack; no VMEM scratch round-trip

        # ---- attention chain (context length 1 => softmax == 1, mix == context)
        b_nl = w_ref[o_bias + 1:o_bias + 2, 0:H]
        b_env = w_ref[o_bias + 2:o_bias + 3, 0:H]
        b_ct = w_ref[o_bias + 3:o_bias + 4, 0:H]
        b_out = w_ref[o_bias + 4:o_bias + 5, 0:R + 1]

        # st and zt each feed two consumers -> one lane-packed dot each.
        st_proj = jnp.dot(st, w_ref[o_st:o_st + H, 0:2 * H],
                          preferred_element_type=jnp.float32)            # (T,2H): [->zt | ->ct]
        zt = jnp.tanh(st_proj[:, 0:H] + nl_proj + b_nl)
        zt_proj = jnp.dot(zt, w_ref[o_zt:o_zt + H, 0:2 * H],
                          preferred_element_type=jnp.float32)            # (T,2H): [->et | ->ct]
        et = jnp.tanh(zt_proj[:, 0:H] + env_proj + b_env)
        et_proj = jnp.dot(et, w_ref[o_et:o_et + H, 0:H],
                          preferred_element_type=jnp.float32)            # (T, H)
        ct = jnp.tanh(st_proj[:, H:2 * H] + zt_proj[:, H:2 * H] + et_proj + b_ct)

        # Fused ct_weights + copy_weights projection: one (H, R+1) matmul.
        proj = (jnp.dot(ct, w_ref[o_out:o_out + H, 0:R + 1],
                        preferred_element_type=jnp.float32) + b_out)     # (T, R+1)
        logits = proj[:, 0:R]
        copy_logit = proj[:, R:R + 1]

        # TODO(synk): prod_rules_masked() is undefined in the source -> the mask is
        # all-valid, so the masked_fill / where is the identity and is omitted.

        # torch F.softmax with no dim on a 3-D (T,1,R) tensor resolves to dim=0 (T).
        m = jnp.max(logits, axis=0, keepdims=True)
        e = jnp.exp(logits - m)
        probs = e / jnp.sum(e, axis=0, keepdims=True)   # exact divide (softmax parity)

        copy_t = jax.nn.sigmoid(copy_logit)             # (T, 1)
        # Final broadcast add requires max_prod_rules == decoder_rnn_size (R == H).
        out_ref[...] = copy_t * et + probs * (1.0 - copy_t)

    return kernel


# --------------------------------------------------------------------------
# Forward (jitted; dims are static, parameters arrive pre-packed)
# --------------------------------------------------------------------------
@functools.partial(jax.jit, static_argnums=(1,))
def decoder_one_forward(w_slab, dims, init_prod, nt_to_rules, nl_encoding, env_encoding):
    # init_prod: (T, 1) int32 indices; nl/env_encoding: (T, 1, H) f32.
    # nt_to_rules is unused by the reference forward; accepted for signature parity.
    del nt_to_rules
    E, H, R, NT = dims
    T = init_prod.shape[0]
    kernel = _build_kernel(T, E, H, R, NT)

    idx = init_prod.reshape(T).astype(jnp.int32)      # free reshape -> SMEM scalars
    nl2d = nl_encoding.reshape(T, H).astype(jnp.float32)
    env2d = env_encoding.reshape(T, H).astype(jnp.float32)

    smem = pl.BlockSpec(memory_space=pltpu.MemorySpace.SMEM)
    vmem = pl.BlockSpec(memory_space=pltpu.MemorySpace.VMEM)
    res2d = pl.pallas_call(
        kernel,
        out_shape=jax.ShapeDtypeStruct((T, H), jnp.float32),
        in_specs=[smem, vmem, vmem, vmem],
        out_specs=vmem,
    )(idx, w_slab, nl2d, env2d)
    return res2d.reshape(T, 1, H)


# --------------------------------------------------------------------------
# Synthetic parameters + pure-JAX reference (same interpretation of the module)
# --------------------------------------------------------------------------
def init_params(key, nt_len, rules_len, E, H, R):
    ks = jax.random.split(key, 16)

    def w(k, shape, scale=0.1):
        return (scale * jax.random.normal(k, shape)).astype(jnp.float32)

    return dict(
        nt_embedding=w(ks[0], (nt_len, E)),
        rules_embedding=w(ks[1], (rules_len, E)),   # declared by the module; unused in forward
        w_ih=w(ks[2], (E + H, 4 * H)),              # input-major (== PyTorch weight_ih_l0.T)
        w_hh=w(ks[3], (H, 4 * H)),                  # == weight_hh_l0.T
        b_ih=w(ks[4], (1, 4 * H)),
        b_hh=w(ks[5], (1, 4 * H)),
        w_nl=w(ks[6], (2 * H, H)),                  # == nl_attention.linear_out.weight.T
        b_nl=w(ks[7], (1, H)),
        w_env=w(ks[8], (2 * H, H)),
        b_env=w(ks[9], (1, H)),
        w_attn=w(ks[10], (3 * H, H)),
        b_attn=w(ks[11], (1, H)),
        w_ct=w(ks[12], (H, R)),
        b_ct=w(ks[13], (1, R)),
        w_copy=w(ks[14], (H, 1)),
        b_copy=w(ks[15], (1, 1)),
    )


def reference_forward(params, init_prod, nl_encoding, env_encoding):
    """Pure-JAX reference with the same interpretation of the (buggy) module."""
    E = params["nt_embedding"].shape[1]
    H = params["w_hh"].shape[0]
    T = init_prod.shape[0]
    hp = jax.lax.Precision.HIGHEST
    dot = lambda a, b: jnp.dot(a, b, precision=hp)

    emb = params["nt_embedding"][init_prod[:, 0]]
    x_proj = dot(emb, params["w_ih"][:E]) + params["b_ih"] + params["b_hh"]
    h = jnp.zeros((1, H), jnp.float32)
    c = jnp.zeros((1, H), jnp.float32)
    hs = []
    for t in range(T):
        g = x_proj[t:t + 1] + dot(h, params["w_hh"])
        i = jax.nn.sigmoid(g[:, :H])
        f = jax.nn.sigmoid(g[:, H:2 * H])
        gg = jnp.tanh(g[:, 2 * H:3 * H])
        o = jax.nn.sigmoid(g[:, 3 * H:])
        c = f * c + i * gg
        h = o * jnp.tanh(c)
        hs.append(h)
    st = jnp.concatenate(hs, axis=0)
    nl = nl_encoding[:, 0, :]
    env = env_encoding[:, 0, :]
    zt = jnp.tanh(dot(st, params["w_nl"][:H]) + dot(nl, params["w_nl"][H:]) + params["b_nl"])
    et = jnp.tanh(dot(zt, params["w_env"][:H]) + dot(env, params["w_env"][H:]) + params["b_env"])
    ct = jnp.tanh(dot(st, params["w_attn"][:H]) + dot(zt, params["w_attn"][H:2 * H])
                  + dot(et, params["w_attn"][2 * H:]) + params["b_attn"])
    logits = dot(ct, params["w_ct"]) + params["b_ct"]
    probs = jax.nn.softmax(logits, axis=0)      # F.softmax(no dim) on 3-D -> dim 0 (T)
    copy_t = jax.nn.sigmoid(dot(ct, params["w_copy"]) + params["b_copy"])
    res = copy_t * et + probs * (1.0 - copy_t)
    return res.reshape(T, 1, H)


if __name__ == "__main__":
    key = jax.random.PRNGKey(0)
    NT_LEN, RULES_LEN = 10, 12
    E, H = 16, 32
    R = H          # max_prod_rules == decoder_rnn_size (needed by the final broadcast add)
    T = 4

    kp, k1, k2, k3 = jax.random.split(key, 4)
    params = init_params(kp, NT_LEN, RULES_LEN, E, H, R)

    # One-time parameter packing, hoisted out of the per-call forward path.
    w_slab, dims = pack_params(params)
    jax.block_until_ready(w_slab)

    init_prod = jax.random.randint(k1, (T, 1), 0, NT_LEN, dtype=jnp.int32)
    nt_to_rules = jnp.zeros((NT_LEN, RULES_LEN), jnp.int32)            # unused by forward
    nl_encoding = (0.1 * jax.random.normal(k2, (T, 1, H))).astype(jnp.float32)
    env_encoding = (0.1 * jax.random.normal(k3, (T, 1, H))).astype(jnp.float32)

    res = decoder_one_forward(w_slab, dims, init_prod, nt_to_rules,
                              nl_encoding, env_encoding)
    jax.block_until_ready(res)
    assert res.shape == (T, 1, H) and res.dtype == jnp.float32

    ref = reference_forward(params, init_prod, nl_encoding, env_encoding)
    np.testing.assert_allclose(np.asarray(res), np.asarray(ref), rtol=2e-3, atol=2e-3)

    print("KERNEL_OK")
</pallas_src>

<mosaic_0001>
module attributes {stable_mosaic.version = 11 : i64} {
  func.func @kernel(%arg0: memref<4xi32, #tpu.memory_space<smem>>, %arg1: memref<256x128xf32, #tpu.memory_space<vmem>>, %arg2: memref<4x32xf32, #tpu.memory_space<vmem>>, %arg3: memref<4x32xf32, #tpu.memory_space<vmem>>, %arg4: memref<4x32xf32, #tpu.memory_space<vmem>>) attributes {dimension_semantics = [], scalar_prefetch = 0 : i64, scratch_operands = 0 : i64, tpu.core_type = #tpu.core_type<tc>} {
    %c0 = arith.constant 0 : index
    %0 = memref.load %arg0[%c0] : memref<4xi32, #tpu.memory_space<smem>>
    %c245_i32 = arith.constant 245 : i32
    %1 = arith.addi %c245_i32, %0 : i32
    %2 = arith.index_cast %1 : i32 to index
    %c0_0 = arith.constant 0 : index
    %3 = vector.load %arg1[%2, %c0_0] : memref<256x128xf32, #tpu.memory_space<vmem>>, vector<1x16xf32>
    %c1 = arith.constant 1 : index
    %4 = memref.load %arg0[%c1] : memref<4xi32, #tpu.memory_space<smem>>
    %c245_i32_1 = arith.constant 245 : i32
    %5 = arith.addi %c245_i32_1, %4 : i32
    %6 = arith.index_cast %5 : i32 to index
    %c0_2 = arith.constant 0 : index
    %7 = vector.load %arg1[%6, %c0_2] : memref<256x128xf32, #tpu.memory_space<vmem>>, vector<1x16xf32>
    %c2 = arith.constant 2 : index
    %8 = memref.load %arg0[%c2] : memref<4xi32, #tpu.memory_space<smem>>
    %c245_i32_3 = arith.constant 245 : i32
    %9 = arith.addi %c245_i32_3, %8 : i32
    %10 = arith.index_cast %9 : i32 to index
    %c0_4 = arith.constant 0 : index
    %11 = vector.load %arg1[%10, %c0_4] : memref<256x128xf32, #tpu.memory_space<vmem>>, vector<1x16xf32>
    %c3 = arith.constant 3 : index
    %12 = memref.load %arg0[%c3] : memref<4xi32, #tpu.memory_space<smem>>
    %c245_i32_5 = arith.constant 245 : i32
    %13 = arith.addi %c245_i32_5, %12 : i32
    %14 = arith.index_cast %13 : i32 to index
    %c0_6 = arith.constant 0 : index
    %15 = vector.load %arg1[%14, %c0_6] : memref<256x128xf32, #tpu.memory_space<vmem>>, vector<1x16xf32>
    %16 = tpu.concatenate %3, %7, %11, %15 in 0 : vector<1x16xf32>, vector<1x16xf32>, vector<1x16xf32>, vector<1x16xf32> -> vector<4x16xf32>
    %c0_7 = arith.constant 0 : index
    %c0_8 = arith.constant 0 : index
    %17 = vector.load %arg1[%c0_7, %c0_8] : memref<256x128xf32, #tpu.memory_space<vmem>>, vector<16x128xf32>
    %cst = arith.constant dense<0.000000e+00> : vector<4x128xf32>
    %18 = tpu.matmul %16, %17, %cst {dimension_numbers = #tpu.dot_dimension_numbers<[1], [0], [0], [1], [0, 0, 1, 1], [], []>} : vector<4x16xf32>, vector<16x128xf32>, vector<4x128xf32> -> vector<4x128xf32>
    %c240 = arith.constant 240 : index
    %c0_9 = arith.constant 0 : index
    %19 = vector.load %arg1[%c240, %c0_9] : memref<256x128xf32, #tpu.memory_space<vmem>>, vector<1x128xf32>
    %20 = vector.broadcast %19 : vector<1x128xf32> to vector<4x128xf32>
    %21 = arith.addf %18, %20 : vector<4x128xf32>
    %c0_10 = arith.constant 0 : index
    %c0_11 = arith.constant 0 : index
    %22 = vector.load %arg2[%c0_10, %c0_11] : memref<4x32xf32, #tpu.memory_space<vmem>>, vector<4x32xf32>
    %c0_12 = arith.constant 0 : index
    %c0_13 = arith.constant 0 : index
    %23 = vector.load %arg3[%c0_12, %c0_13] : memref<4x32xf32, #tpu.memory_space<vmem>>, vector<4x32xf32>
    %c112 = arith.constant 112 : index
    %c0_14 = arith.constant 0 : index
    %24 = vector.load %arg1[%c112, %c0_14] : memref<256x128xf32, #tpu.memory_space<vmem>>, vector<32x32xf32>
    %cst_15 = arith.constant dense<0.000000e+00> : vector<4x32xf32>
    %25 = tpu.matmul %22, %24, %cst_15 {dimension_numbers = #tpu.dot_dimension_numbers<[1], [0], [0], [1], [0, 0, 1, 1], [], []>} : vector<4x32xf32>, vector<32x32xf32>, vector<4x32xf32> -> vector<4x32xf32>
    %c144 = arith.constant 144 : index
    %c0_16 = arith.constant 0 : index
    %26 = vector.load %arg1[%c144, %c0_16] : memref<256x128xf32, #tpu.memory_space<vmem>>, vector<32x32xf32>
    %cst_17 = arith.constant dense<0.000000e+00> : vector<4x32xf32>
    %27 = tpu.matmul %23, %26, %cst_17 {dimension_numbers = #tpu.dot_dimension_numbers<[1], [0], [0], [1], [0, 0, 1, 1], [], []>} : vector<4x32xf32>, vector<32x32xf32>, vector<4x32xf32> -> vector<4x32xf32>
    %c16 = arith.constant 16 : index
    %c0_18 = arith.constant 0 : index
    %28 = vector.load %arg1[%c16, %c0_18] : memref<256x128xf32, #tpu.memory_space<vmem>>, vector<32x128xf32>
    %cst_19 = arith.constant 0.000000e+00 : f32
    %29 = vector.broadcast %cst_19 : f32 to vector<1x32xf32>
    %cst_20 = arith.constant 0.000000e+00 : f32
    %30 = vector.broadcast %cst_20 : f32 to vector<1x32xf32>
    %31 = vector.extract_strided_slice %21 {offsets = [0, 0], sizes = [1, 128], strides = [1, 1]} : vector<4x128xf32> to vector<1x128xf32>
    %cst_21 = arith.constant dense<0.000000e+00> : vector<1x128xf32>
    %32 = tpu.matmul %29, %28, %cst_21 {dimension_numbers = #tpu.dot_dimension_numbers<[1], [0], [0], [1], [0, 0, 1, 1], [], []>} : vector<1x32xf32>, vector<32x128xf32>, vector<1x128xf32> -> vector<1x128xf32>
    %33 = arith.addf %31, %32 : vector<1x128xf32>
    %34 = vector.extract_strided_slice %33 {offsets = [0, 0], sizes = [1, 32], strides = [1, 1]} : vector<1x128xf32> to vector<1x32xf32>
    %35 = arith.negf %34 : vector<1x32xf32>
    %36 = math.exp %35 : vector<1x32xf32>
    %cst_22 = arith.constant 1.000000e+00 : f32
    %37 = vector.broadcast %cst_22 : f32 to vector<1x32xf32>
    %38 = arith.addf %37, %36 : vector<1x32xf32>
    %39 = arith.divf %37, %38 : vector<1x32xf32>
    %40 = vector.extract_strided_slice %33 {offsets = [0, 32], sizes = [1, 32], strides = [1, 1]} : vector<1x128xf32> to vector<1x32xf32>
    %41 = arith.negf %40 : vector<1x32xf32>
    %42 = math.exp %41 : vector<1x32xf32>
    %cst_23 = arith.constant 1.000000e+00 : f32
    %43 = vector.broadcast %cst_23 : f32 to vector<1x32xf32>
    %44 = arith.addf %43, %42 : vector<1x32xf32>
    %45 = arith.divf %43, %44 : vector<1x32xf32>
    %46 = vector.extract_strided_slice %33 {offsets = [0, 64], sizes = [1, 32], strides = [1, 1]} : vector<1x128xf32> to vector<1x32xf32>
    %47 = math.tanh %46 : vector<1x32xf32>
    %48 = vector.extract_strided_slice %33 {offsets = [0, 96], sizes = [1, 32], strides = [1, 1]} : vector<1x128xf32> to vector<1x32xf32>
    %49 = arith.negf %48 : vector<1x32xf32>
    %50 = math.exp %49 : vector<1x32xf32>
    %cst_24 = arith.constant 1.000000e+00 : f32
    %51 = vector.broadcast %cst_24 : f32 to vector<1x32xf32>
    %52 = arith.addf %51, %50 : vector<1x32xf32>
    %53 = arith.divf %51, %52 : vector<1x32xf32>
    %54 = arith.mulf %45, %30 : vector<1x32xf32>
    %55 = arith.mulf %39, %47 : vector<1x32xf32>
    %56 = arith.addf %54, %55 : vector<1x32xf32>
    %57 = math.tanh %56 : vector<1x32xf32>
    %58 = arith.mulf %53, %57 : vector<1x32xf32>
    %59 = vector.extract_strided_slice %21 {offsets = [1, 0], sizes = [1, 128], strides = [1, 1]} : vector<4x128xf32> to vector<1x128xf32>
    %cst_25 = arith.constant dense<0.000000e+00> : vector<1x128xf32>
    %60 = tpu.matmul %58, %28, %cst_25 {dimension_numbers = #tpu.dot_dimension_numbers<[1], [0], [0], [1], [0, 0, 1, 1], [], []>} : vector<1x32xf32>, vector<32x128xf32>, vector<1x128xf32> -> vector<1x128xf32>
    %61 = arith.addf %59, %60 : vector<1x128xf32>
    %62 = vector.extract_strided_slice %61 {offsets = [0, 0], sizes = [1, 32], strides = [1, 1]} : vector<1x128xf32> to vector<1x32xf32>
    %63 = arith.negf %62 : vector<1x32xf32>
    %64 = math.exp %63 : vector<1x32xf32>
    %cst_26 = arith.constant 1.000000e+00 : f32
    %65 = vector.broadcast %cst_26 : f32 to vector<1x32xf32>
    %66 = arith.addf %65, %64 : vector<1x32xf32>
    %67 = arith.divf %65, %66 : vector<1x32xf32>
    %68 = vector.extract_strided_slice %61 {offsets = [0, 32], sizes = [1, 32], strides = [1, 1]} : vector<1x128xf32> to vector<1x32xf32>
    %69 = arith.negf %68 : vector<1x32xf32>
    %70 = math.exp %69 : vector<1x32xf32>
    %cst_27 = arith.constant 1.000000e+00 : f32
    %71 = vector.broadcast %cst_27 : f32 to vector<1x32xf32>
    %72 = arith.addf %71, %70 : vector<1x32xf32>
    %73 = arith.divf %71, %72 : vector<1x32xf32>
    %74 = vector.extract_strided_slice %61 {offsets = [0, 64], sizes = [1, 32], strides = [1, 1]} : vector<1x128xf32> to vector<1x32xf32>
    %75 = math.tanh %74 : vector<1x32xf32>
    %76 = vector.extract_strided_slice %61 {offsets = [0, 96], sizes = [1, 32], strides = [1, 1]} : vector<1x128xf32> to vector<1x32xf32>
    %77 = arith.negf %76 : vector<1x32xf32>
    %78 = math.exp %77 : vector<1x32xf32>
    %cst_28 = arith.constant 1.000000e+00 : f32
    %79 = vector.broadcast %cst_28 : f32 to vector<1x32xf32>
    %80 = arith.addf %79, %78 : vector<1x32xf32>
    %81 = arith.divf %79, %80 : vector<1x32xf32>
    %82 = arith.mulf %73, %56 : vector<1x32xf32>
    %83 = arith.mulf %67, %75 : vector<1x32xf32>
    %84 = arith.addf %82, %83 : vector<1x32xf32>
    %85 = math.tanh %84 : vector<1x32xf32>
    %86 = arith.mulf %81, %85 : vector<1x32xf32>
    %87 = vector.extract_strided_slice %21 {offsets = [2, 0], sizes = [1, 128], strides = [1, 1]} : vector<4x128xf32> to vector<1x128xf32>
    %cst_29 = arith.constant dense<0.000000e+00> : vector<1x128xf32>
    %88 = tpu.matmul %86, %28, %cst_29 {dimension_numbers = #tpu.dot_dimension_numbers<[1], [0], [0], [1], [0, 0, 1, 1], [], []>} : vector<1x32xf32>, vector<32x128xf32>, vector<1x128xf32> -> vector<1x128xf32>
    %89 = arith.addf %87, %88 : vector<1x128xf32>
    %90 = vector.extract_strided_slice %89 {offsets = [0, 0], sizes = [1, 32], strides = [1, 1]} : vector<1x128xf32> to vector<1x32xf32>
    %91 = arith.negf %90 : vector<1x32xf32>
    %92 = math.exp %91 : vector<1x32xf32>
    %cst_30 = arith.constant 1.000000e+00 : f32
    %93 = vector.broadcast %cst_30 : f32 to vector<1x32xf32>
    %94 = arith.addf %93, %92 : vector<1x32xf32>
    %95 = arith.divf %93, %94 : vector<1x32xf32>
    %96 = vector.extract_strided_slice %89 {offsets = [0, 32], sizes = [1, 32], strides = [1, 1]} : vector<1x128xf32> to vector<1x32xf32>
    %97 = arith.negf %96 : vector<1x32xf32>
    %98 = math.exp %97 : vector<1x32xf32>
    %cst_31 = arith.constant 1.000000e+00 : f32
    %99 = vector.broadcast %cst_31 : f32 to vector<1x32xf32>
    %100 = arith.addf %99, %98 : vector<1x32xf32>
    %101 = arith.divf %99, %100 : vector<1x32xf32>
    %102 = vector.extract_strided_slice %89 {offsets = [0, 64], sizes = [1, 32], strides = [1, 1]} : vector<1x128xf32> to vector<1x32xf32>
    %103 = math.tanh %102 : vector<1x32xf32>
    %104 = vector.extract_strided_slice %89 {offsets = [0, 96], sizes = [1, 32], strides = [1, 1]} : vector<1x128xf32> to vector<1x32xf32>
    %105 = arith.negf %104 : vector<1x32xf32>
    %106 = math.exp %105 : vector<1x32xf32>
    %cst_32 = arith.constant 1.000000e+00 : f32
    %107 = vector.broadcast %cst_32 : f32 to vector<1x32xf32>
    %108 = arith.addf %107, %106 : vector<1x32xf32>
    %109 = arith.divf %107, %108 : vector<1x32xf32>
    %110 = arith.mulf %101, %84 : vector<1x32xf32>
    %111 = arith.mulf %95, %103 : vector<1x32xf32>
    %112 = arith.addf %110, %111 : vector<1x32xf32>
    %113 = math.tanh %112 : vector<1x32xf32>
    %114 = arith.mulf %109, %113 : vector<1x32xf32>
    %115 = vector.extract_strided_slice %21 {offsets = [3, 0], sizes = [1, 128], strides = [1, 1]} : vector<4x128xf32> to vector<1x128xf32>
    %cst_33 = arith.constant dense<0.000000e+00> : vector<1x128xf32>
    %116 = tpu.matmul %114, %28, %cst_33 {dimension_numbers = #tpu.dot_dimension_numbers<[1], [0], [0], [1], [0, 0, 1, 1], [], []>} : vector<1x32xf32>, vector<32x128xf32>, vector<1x128xf32> -> vector<1x128xf32>
    %117 = arith.addf %115, %116 : vector<1x128xf32>
    %118 = vector.extract_strided_slice %117 {offsets = [0, 0], sizes = [1, 32], strides = [1, 1]} : vector<1x128xf32> to vector<1x32xf32>
    %119 = arith.negf %118 : vector<1x32xf32>
    %120 = math.exp %119 : vector<1x32xf32>
    %cst_34 = arith.constant 1.000000e+00 : f32
    %121 = vector.broadcast %cst_34 : f32 to vector<1x32xf32>
    %122 = arith.addf %121, %120 : vector<1x32xf32>
    %123 = arith.divf %121, %122 : vector<1x32xf32>
    %124 = vector.extract_strided_slice %117 {offsets = [0, 32], sizes = [1, 32], strides = [1, 1]} : vector<1x128xf32> to vector<1x32xf32>
    %125 = arith.negf %124 : vector<1x32xf32>
    %126 = math.exp %125 : vector<1x32xf32>
    %cst_35 = arith.constant 1.000000e+00 : f32
    %127 = vector.broadcast %cst_35 : f32 to vector<1x32xf32>
    %128 = arith.addf %127, %126 : vector<1x32xf32>
    %129 = arith.divf %127, %128 : vector<1x32xf32>
    %130 = vector.extract_strided_slice %117 {offsets = [0, 64], sizes = [1, 32], strides = [1, 1]} : vector<1x128xf32> to vector<1x32xf32>
    %131 = math.tanh %130 : vector<1x32xf32>
    %132 = vector.extract_strided_slice %117 {offsets = [0, 96], sizes = [1, 32], strides = [1, 1]} : vector<1x128xf32> to vector<1x32xf32>
    %133 = arith.negf %132 : vector<1x32xf32>
    %134 = math.exp %133 : vector<1x32xf32>
    %cst_36 = arith.constant 1.000000e+00 : f32
    %135 = vector.broadcast %cst_36 : f32 to vector<1x32xf32>
    %136 = arith.addf %135, %134 : vector<1x32xf32>
    %137 = arith.divf %135, %136 : vector<1x32xf32>
    %138 = arith.mulf %129, %112 : vector<1x32xf32>
    %139 = arith.mulf %123, %131 : vector<1x32xf32>
    %140 = arith.addf %138, %139 : vector<1x32xf32>
    %141 = math.tanh %140 : vector<1x32xf32>
    %142 = arith.mulf %137, %141 : vector<1x32xf32>
    %143 = tpu.concatenate %58, %86, %114, %142 in 0 : vector<1x32xf32>, vector<1x32xf32>, vector<1x32xf32>, vector<1x32xf32> -> vector<4x32xf32>
    %c241 = arith.constant 241 : index
    %c0_37 = arith.constant 0 : index
    %144 = vector.load %arg1[%c241, %c0_37] : memref<256x128xf32, #tpu.memory_space<vmem>>, vector<1x32xf32>
    %c242 = arith.constant 242 : index
    %c0_38 = arith.constant 0 : index
    %145 = vector.load %arg1[%c242, %c0_38] : memref<256x128xf32, #tpu.memory_space<vmem>>, vector<1x32xf32>
    %c243 = arith.constant 243 : index
    %c0_39 = arith.constant 0 : index
    %146 = vector.load %arg1[%c243, %c0_39] : memref<256x128xf32, #tpu.memory_space<vmem>>, vector<1x32xf32>
    %c244 = arith.constant 244 : index
    %c0_40 = arith.constant 0 : index
    %147 = vector.load %arg1[%c244, %c0_40] : memref<256x128xf32, #tpu.memory_space<vmem>>, vector<1x33xf32>
    %c48 = arith.constant 48 : index
    %c0_41 = arith.constant 0 : index
    %148 = vector.load %arg1[%c48, %c0_41] : memref<256x128xf32, #tpu.memory_space<vmem>>, vector<32x64xf32>
    %cst_42 = arith.constant dense<0.000000e+00> : vector<4x64xf32>
    %149 = tpu.matmul %143, %148, %cst_42 {dimension_numbers = #tpu.dot_dimension_numbers<[1], [0], [0], [1], [0, 0, 1, 1], [], []>} : vector<4x32xf32>, vector<32x64xf32>, vector<4x64xf32> -> vector<4x64xf32>
    %150 = vector.extract_strided_slice %149 {offsets = [0, 0], sizes = [4, 32], strides = [1, 1]} : vector<4x64xf32> to vector<4x32xf32>
    %151 = arith.addf %150, %25 : vector<4x32xf32>
    %152 = vector.broadcast %144 : vector<1x32xf32> to vector<4x32xf32>
    %153 = arith.addf %151, %152 : vector<4x32xf32>
    %154 = math.tanh %153 : vector<4x32xf32>
    %c80 = arith.constant 80 : index
    %c0_43 = arith.constant 0 : index
    %155 = vector.load %arg1[%c80, %c0_43] : memref<256x128xf32, #tpu.memory_space<vmem>>, vector<32x64xf32>
    %cst_44 = arith.constant dense<0.000000e+00> : vector<4x64xf32>
    %156 = tpu.matmul %154, %155, %cst_44 {dimension_numbers = #tpu.dot_dimension_numbers<[1], [0], [0], [1], [0, 0, 1, 1], [], []>} : vector<4x32xf32>, vector<32x64xf32>, vector<4x64xf32> -> vector<4x64xf32>
    %157 = vector.extract_strided_slice %156 {offsets = [0, 0], sizes = [4, 32], strides = [1, 1]} : vector<4x64xf32> to vector<4x32xf32>
    %158 = arith.addf %157, %27 : vector<4x32xf32>
    %159 = vector.broadcast %145 : vector<1x32xf32> to vector<4x32xf32>
    %160 = arith.addf %158, %159 : vector<4x32xf32>
    %161 = math.tanh %160 : vector<4x32xf32>
    %c176 = arith.constant 176 : index
    %c0_45 = arith.constant 0 : index
    %162 = vector.load %arg1[%c176, %c0_45] : memref<256x128xf32, #tpu.memory_space<vmem>>, vector<32x32xf32>
    %cst_46 = arith.constant dense<0.000000e+00> : vector<4x32xf32>
    %163 = tpu.matmul %161, %162, %cst_46 {dimension_numbers = #tpu.dot_dimension_numbers<[1], [0], [0], [1], [0, 0, 1, 1], [], []>} : vector<4x32xf32>, vector<32x32xf32>, vector<4x32xf32> -> vector<4x32xf32>
    %164 = vector.extract_strided_slice %149 {offsets = [0, 32], sizes = [4, 32], strides = [1, 1]} : vector<4x64xf32> to vector<4x32xf32>
    %165 = vector.extract_strided_slice %156 {offsets = [0, 32], sizes = [4, 32], strides = [1, 1]} : vector<4x64xf32> to vector<4x32xf32>
    %166 = arith.addf %164, %165 : vector<4x32xf32>
    %167 = arith.addf %166, %163 : vector<4x32xf32>
    %168 = vector.broadcast %146 : vector<1x32xf32> to vector<4x32xf32>
    %169 = arith.addf %167, %168 : vector<4x32xf32>
    %170 = math.tanh %169 : vector<4x32xf32>
    %c208 = arith.constant 208 : index
    %c0_47 = arith.constant 0 : index
    %171 = vector.load %arg1[%c208, %c0_47] : memref<256x128xf32, #tpu.memory_space<vmem>>, vector<32x33xf32>
    %cst_48 = arith.constant dense<0.000000e+00> : vector<4x33xf32>
    %172 = tpu.matmul %170, %171, %cst_48 {dimension_numbers = #tpu.dot_dimension_numbers<[1], [0], [0], [1], [0, 0, 1, 1], [], []>} : vector<4x32xf32>, vector<32x33xf32>, vector<4x33xf32> -> vector<4x33xf32>
    %173 = vector.broadcast %147 : vector<1x33xf32> to vector<4x33xf32>
    %174 = arith.addf %172, %173 : vector<4x33xf32>
    %175 = vector.extract_strided_slice %174 {offsets = [0, 0], sizes = [4, 32], strides = [1, 1]} : vector<4x33xf32> to vector<4x32xf32>
    %176 = vector.extract_strided_slice %174 {offsets = [0, 32], sizes = [4, 1], strides = [1, 1]} : vector<4x33xf32> to vector<4x1xf32>
    %cst_49 = arith.constant dense<0xFF800000> : vector<32xf32>
    %177 = vector.multi_reduction <maximumf>, %175, %cst_49 [0] : vector<4x32xf32> to vector<32xf32>
    %178 = vector.shape_cast %177 : vector<32xf32> to vector<1x32xf32>
    %179 = vector.broadcast %178 : vector<1x32xf32> to vector<4x32xf32>
    %180 = arith.subf %175, %179 : vector<4x32xf32>
    %181 = math.exp %180 : vector<4x32xf32>
    %cst_50 = arith.constant dense<0.000000e+00> : vector<32xf32>
    %182 = vector.multi_reduction <add>, %181, %cst_50 [0] : vector<4x32xf32> to vector<32xf32>
    %183 = vector.shape_cast %182 : vector<32xf32> to vector<1x32xf32>
    %184 = vector.broadcast %183 : vector<1x32xf32> to vector<4x32xf32>
    %185 = arith.divf %181, %184 : vector<4x32xf32>
    %186 = arith.negf %176 : vector<4x1xf32>
    %187 = math.exp %186 : vector<4x1xf32>
    %cst_51 = arith.constant 1.000000e+00 : f32
    %188 = vector.broadcast %cst_51 : f32 to vector<4x1xf32>
    %189 = arith.addf %188, %187 : vector<4x1xf32>
    %190 = arith.divf %188, %189 : vector<4x1xf32>
    %191 = vector.broadcast %190 : vector<4x1xf32> to vector<4x32xf32>
    %192 = arith.mulf %191, %161 : vector<4x32xf32>
    %cst_52 = arith.constant 1.000000e+00 : f32
    %193 = vector.broadcast %cst_52 : f32 to vector<4x1xf32>
    %194 = arith.subf %193, %190 : vector<4x1xf32>
    %195 = vector.broadcast %194 : vector<4x1xf32> to vector<4x32xf32>
    %196 = arith.mulf %185, %195 : vector<4x32xf32>
    %197 = arith.addf %192, %196 : vector<4x32xf32>
    %c0_53 = arith.constant 0 : index
    %c0_54 = arith.constant 0 : index
    %198 = vector.load %arg4[%c0_53, %c0_54] : memref<4x32xf32, #tpu.memory_space<vmem>>, vector<4x32xf32>
    tpu.vector_store %arg4[%c0_53, %c0_54], %197 {strides = array<i32>} : memref<4x32xf32, #tpu.memory_space<vmem>>, vector<4x32xf32>,
    return
  }
}

</mosaic_0001>

<bundles_post_ra>
// kernel: decoder_one_forward.1
= control target key start
LH: loop header
LB: loop body
LE: loop exit
PB: predicated region body
PF: predicated region fallthrough
CT: control target
= control target key end

     0   :  { %9 = vsyncpa [#allocation5], 0  ;;  %s996_s0 = inlined_call_operand.hbm [shape: s32[4], index: 0, kind: input, shape index: {}]   ;;  %s997_s1 = inlined_call_operand.hbm [shape: f32[256,128], index: 1, kind: input, shape index: {}]   ;;  %s998_s2 = inlined_call_operand.vmem [shape: f32[4,32], index: 2, kind: input, shape index: {}]   ;;  %s999_s3 = inlined_call_operand.hbm [shape: f32[4,32], index: 3, kind: input, shape index: {}]   ;;  %s1000_s4 = inlined_call_operand.hbm [shape: f32[4,32], index: 4, kind: output, shape index: {}]  }
   0x1   :  { %10 = vsyncpa [#allocation3], 0 }
   0x2   :  { %11 = vsyncpa [#allocation8], 0 }
   0x3   :  { %12 = vsyncpa [#allocation4], 0  ;;  %s18_s17 = sshll.u32 %s996_s0, 4  ;;  %s26_s20 = sshll.u32 %s997_s1, 4  ;;  %s19_s17 = int_to_ptr.hbm [resolvable:$true] %s18_s17  ;;  %s27_s20 = int_to_ptr.hbm [resolvable:$true] %s26_s20 }
   0x4   :  { %s865_s21 = smov [#allocation2]   ;;  %s866_s22 = smov [#allocation6]  }
   0x5   :  { %21 = dma.hbm_to_smem %s19_s17, 16, %s865_s21, [#allocation5]  }
   0x6   :  { %s28_s23 = sshll.u32 %s866_s22, 4  ;;  %s867_s24 = smov 128   ;;  %s29_s23 = int_to_ptr.vmem [resolvable:$true] %s28_s23 }
   0x7   :  { %s868_s25 = smov 8   ;;  %s42_s28 = sshll.u32 %s999_s3, 4  ;;  %s43_s28 = int_to_ptr.hbm [resolvable:$true] %s42_s28 }
   0x8   :  { %34 = dma.hbm_to_vmem [thread:$0]  %s27_s20, 4096, %s29_s23, [#allocation3], %s867_s24, %s867_s24, %s868_s25  }
   0x9   :  { %s869_s0 = smov [#allocation7]  }
   0xa   :  { %s44_s29 = sshll.u32 %s869_s0, 4  ;;  %s45_s29 = int_to_ptr.vmem [resolvable:$true] %s44_s29 }
   0xb   :  { %47 = dma.hbm_to_vmem [thread:$0]  %s43_s28, 64, %s45_s29, [#allocation8]  }
   0xc   :  { %857 = dma.done.wait [#allocation5], 16  }
   0xd   :  { %858 = vsyncadd [#allocation5], 4294967280 }
   0xe   :  { %859 = dma.done.wait [#allocation3], 4096  }
   0xf   :  { %860 = vsyncadd [#allocation3], 4294963200 }
  0x10   :  { %861 = dma.done.wait [#allocation8], 64  }
  0x11   :  { %862 = vsyncadd [#allocation8], 4294967232 }
  0x12   :  { %60 = sfence }
  0x13   :  { %v910_v0 = vld [vmem:[#allocation6 + $0x28] sm:$0xff]  ;;  %v912_v1 = vld [vmem:[#allocation6 + $0x20] sm:$0xff]  ;;  %s61_s1 = sld [smem:[#allocation2]]  ;;  %v915_v4 = vld [vmem:[#allocation6 + $0x18] sm:$0xff]  ;;  %v870_v6 = vmov 0.0   ;;  %vm86_vm0 = vcmask 1040384  }
  0x14   :  { %196 = vmatpush.msra.mxu3 %v910_v0  ;;  %v93_v2 = vld [vmem:[#allocation6 + $0x8] sm:$0xff]  ;;  %v92_v3 = vld [vmem:[#allocation6] sm:$0xff]  ;;  %s687_s3 = sld [smem:[#allocation2 + $0x1]]  ;;  %v918_v5 = vld [vmem:[#allocation6 + $0x10] sm:$0xff]  ;;  %vm88_vm1 = vcmask 1041408   ;;  %vm90_vm2 = vcmask 1042432  }
  0x15   :  { %114 = vmatpush.msra.mxu0 %v93_v2  ;;  %s689_s30 = sld [smem:[#allocation2 + $0x2]]  ;;  %vm96_vm3 = vcmask 130048   ;;  %v722_v17 = vld [vmem:[#allocation6 + $0xf0] ss:$0 sm:$0xff]  ;;  %s871_s10 = smov 64   ;;  %vm126_vm8 = vcmask 261120  }
  0x16   :  { %197 = vmatpush.msra.mxu3 %v912_v1  ;;  %s691_s5 = sld [smem:[#allocation2 + $0x3]]  ;;  %s872_s11 = smov 32  }
  0x17   :  { %115 = vmatpush.msra.mxu0 %v92_v3  ;;  %s875_s14 = smov [#allocation9]   ;;  %s666_s18 = sshll.u32 %s1000_s4, 4  ;;  %s667_s18 = int_to_ptr.hbm [resolvable:$true] %s666_s18 }
  0x18   :  { %198 = vmatpush.msra.mxu3 %v915_v4  ;;  %s664_s15 = sshll.u32 %s875_s14, 4  ;;  %s665_s15 = int_to_ptr.vmem [resolvable:$true] %s664_s15 }
  0x19   :  { %259 = vmatpush.msrb.mxu0 %v910_v0  ;;  %s678_s6 = scalar_lea.vmem [#allocation6], %s61_s1 }
  0x1a   :  { %199 = vmatpush.msra.mxu3 %v918_v5  ;;  %v686_v7 = vld [vmem:[%s678_s6 + $0xf5] sm:$0x1]  ;;  %s680_s7 = scalar_lea.vmem [#allocation6], %s687_s3 }
  0x1b   :  { %260 = vmatpush.msrb.mxu0 %v912_v1  ;;  %200 = vmatmul.f32.vlgmr.msra.gmra.mxu3 %v870_v6  ;;  %v688_v8 = vld [vmem:[%s680_s7 + $0xf5] sm:$0x1]  ;;  %s682_s8 = scalar_lea.vmem [#allocation6], %s689_s30 }
  0x1c   :  { %v690_v9 = vld [vmem:[%s682_s8 + $0xf5] sm:$0x1]  ;;  %v78_v10 = vrot.slane %v688_v8, 7  ;;  %s684_s9 = scalar_lea.vmem [#allocation6], %s691_s5 }
  0x1d   :  { %261 = vmatpush.msrb.mxu0 %v915_v4  ;;  %v692_v11 = vld [vmem:[%s684_s9 + $0xf5] sm:$0x1]  ;;  %v81_v12 = vrot.slane %v690_v9, 6  ;;  %v125_v9 = vld [vmem:[#allocation6 + $0x88] sm:$0xff] }
  0x1e   :  { %v84_v13 = vrot.slane %v692_v11, 5  ;;  %v87_v14 = vsel %vm86_vm0, %v686_v7, %v78_v10  ;;  %v124_v10 = vld [vmem:[#allocation6 + $0x80] sm:$0xff]  ;;  %142 = vmatpush.msra.mxu1 %v125_v9  ;;  %v123_v11 = vld [vmem:[#allocation6 + $0x78] sm:$0xff] }
  0x1f   :  { %262 = vmatpush.msrb.mxu0 %v918_v5  ;;  %v89_v15 = vsel %vm88_vm1, %v87_v14, %v81_v12  ;;  %v122_v12 = vld [vmem:[#allocation6 + $0x70] sm:$0xff] }
  0x20   :  { %v91_v16 = vsel %vm90_vm2, %v89_v15, %v84_v13  ;;  %143 = vmatpush.msra.mxu1 %v124_v10  ;;  %v120_v13 = vld [vmem:[%s998_s2] sm:$0xf]  ;;  %s873_s2 = smov 96  }
  0x21   :  { %693 = vmatmul.msk.f32.vlgmr.msra.gmra.mxu0 %vm96_vm3, %v91_v16 }
  0x22   :  { %144 = vmatpush.msra.mxu1 %v123_v11 }
  0x24   :  { %145 = vmatpush.msra.mxu1 %v122_v12 }
  0x25   :  { %694 = vmatmul.msk.f32.vlgmr.msra.gmra.mxu1 %vm126_vm8, %v120_v13 }
  0x26   :  { %329 = vmatpush.msrb.mxu1 %v910_v0 }
  0x28   :  { %330 = vmatpush.msrb.mxu1 %v912_v1 }
  0x2a   :  { %331 = vmatpush.msrb.mxu1 %v915_v4 }
  0x2c   :  { %332 = vmatpush.msrb.mxu1 %v918_v5 }
  0x9e   :  { %v117_v18 = vpop.f32.mrf.mxu0  ;;  %v201_v19 = vpop.f32.mrf.mxu3 }
  0x9f   :  { %v929_v20 = vadd.f32 %v722_v17, %v117_v18 }
  0xa1   :  { %v204_v21 = vadd.f32 %v201_v19, %v929_v20 }
  0xa2   :  { %v954_v18 = vpop.f32.mrf.mxu1 }
  0xa3   :  { %727 = vtanh.f32 %v204_v21  ;;  %v696_v23 = vmul.f32 -1.442695, %v204_v21 }
  0xa5   :  { %729 = vpow2.f32 %v696_v23 }
  0xa9   :  { %v728_v22 = vpop.eup %727 }
  0xaa   :  { %227 = vrot.lane.b32.xlu0 %v728_v22, %s871_s10 }
  0xab   :  { %v730_v24 = vpop.eup %729 }
  0xac   :  { %v208_v25 = vadd.f32 1.0, %v730_v24 }
  0xae   :  { %731 = vrcp.f32 %v208_v25  ;;  %v220_v31 = vand.u32 2147483648, %v208_v25  ;;  %vm214_vm5 = vweird.f32 %v208_v25  ;;  %v218_v32 = vand.u32 2147483647, %v208_v25 }
  0xb0   :  { %v221_v34 = vor.u32 1.1754944e-38, %v220_v31  ;;  %vm219_vm7 = vcmp.eq.f32.partialorder %v218_v32, 8.507059e+37 }
  0xb4   :  { %v732_v26 = vpop.eup %731 }
  0xb5   :  { %v210_v27 = vmul.f32 %v732_v26, %v208_v25  ;;  %vm215_vm4 = vweird.f32 %v732_v26 }
  0xb6   :  { %vm216_vm6 = vmor %vm214_vm5, %vm215_vm4 }
  0xb7   :  { %v211_v28 = vsub.f32 1.0, %v210_v27 }
  0xb9   :  { %v212_v29 = vmul.f32 %v732_v26, %v211_v28 }
  0xbb   :  { %v213_v30 = vadd.f32 %v732_v26, %v212_v29 }
  0xbd   :  { %v217_v33 = vsel %vm216_vm6, %v732_v26, %v213_v30 }
  0xbe   :  { %v222_v36 = vsel %vm219_vm7, %v221_v34, %v217_v33 }
  0xbf   :  { %v225_v38 = vmul.f32 0.0, %v222_v36 }
 0x11c   :  { %v228_v35 = vpop.permute.xlu0 %227 }
 0x11d   :  { %v230_v37 = vmul.f32 %v228_v35, %v222_v36 }
 0x11f   :  { %232 = vrot.lane.b32.xlu0 %v230_v37, %s872_s11 }
 0x191   :  { %v233_v39 = vpop.permute.xlu0 %232 }
 0x192   :  { %v235_v40 = vadd.f32 %v233_v39, %v225_v38 }
 0x194   :  { %733 = vtanh.f32 %v235_v40  ;;  %v292_v2 = vrot.slane %v235_v40, 7 }
 0x19a   :  { %v734_v41 = vpop.eup %733 }
 0x19b   :  { %238 = vrot.lane.b32.xlu1 %v734_v41, %s871_s10 }
 0x20d   :  { %v239_v42 = vpop.permute.xlu1 %238 }
 0x20e   :  { %v935_v43 = vmul.f32 %v239_v42, %v222_v36 }
 0x210   :  { %243 = vrot.lane.b32.xlu1 %v935_v43, %s872_s11 }
 0x282   :  { %v244_v44 = vpop.permute.xlu1 %243 }
 0x283   :  { %697 = vmatmul.msk.f32.vlgmr.msrb.gmra.mxu0 %vm126_vm8, %v244_v44 }
 0x300   :  { %v264_v45 = vpop.f32.mrf.mxu0 }
 0x301   :  { %v268_v46 = vrot.slane %v264_v45, 7  ;;  %v153_v45 = vld [vmem:[#allocation6 + $0xa8] sm:$0xff] }
 0x302   :  { %169 = vmatpush.msra.mxu2 %v153_v45  ;;  %v565_v45 = vld [vmem:[#allocation6 + $0xe8] sm:$0xff] }
 0x303   :  { %v270_v47 = vadd.f32 %v268_v46, %v929_v20  ;;  %v152_v46 = vld [vmem:[#allocation6 + $0xa0] sm:$0xff] }
 0x304   :  { %170 = vmatpush.msra.mxu2 %v152_v46  ;;  %v564_v46 = vld [vmem:[#allocation6 + $0xe0] sm:$0xff] }
 0x305   :  { %735 = vtanh.f32 %v270_v47  ;;  %v698_v49 = vmul.f32 -1.442695, %v270_v47  ;;  %v151_v47 = vld [vmem:[#allocation6 + $0x98] sm:$0xff] }
 0x306   :  { %171 = vmatpush.msra.mxu2 %v151_v47  ;;  %v563_v47 = vld [vmem:[#allocation6 + $0xd8] sm:$0xff] }
 0x307   :  { %737 = vpow2.f32 %v698_v49  ;;  %v121_v49 = vld [vmem:[#allocation7] sm:$0xf] }
 0x30b   :  { %v736_v48 = vpop.eup %735 }
 0x30c   :  { %296 = vrot.lane.b32.xlu2 %v736_v48, %s871_s10  ;;  %v150_v48 = vld [vmem:[#allocation6 + $0x90] sm:$0xff] }
 0x30d   :  { %v738_v50 = vpop.eup %737  ;;  %172 = vmatpush.msra.mxu2 %v150_v48  ;;  %v562_v48 = vld [vmem:[#allocation6 + $0xd0] sm:$0xff] }
 0x30e   :  { %v274_v51 = vadd.f32 1.0, %v738_v50  ;;  %695 = vmatmul.msk.f32.vlgmr.msra.gmra.mxu2 %vm126_vm8, %v121_v49 }
 0x30f   :  { %399 = vmatpush.msrb.mxu2 %v910_v0 }
 0x310   :  { %739 = vrcp.f32 %v274_v51  ;;  %v286_v57 = vand.u32 2147483648, %v274_v51  ;;  %vm280_vm10 = vweird.f32 %v274_v51  ;;  %v284_v58 = vand.u32 2147483647, %v274_v51 }
 0x311   :  { %400 = vmatpush.msrb.mxu2 %v912_v1 }
 0x312   :  { %v287_v60 = vor.u32 1.1754944e-38, %v286_v57  ;;  %vm285_vm12 = vcmp.eq.f32.partialorder %v284_v58, 8.507059e+37 }
 0x313   :  { %401 = vmatpush.msrb.mxu2 %v915_v4 }
 0x315   :  { %402 = vmatpush.msrb.mxu2 %v918_v5 }
 0x316   :  { %v740_v52 = vpop.eup %739 }
 0x317   :  { %v276_v53 = vmul.f32 %v740_v52, %v274_v51  ;;  %vm281_vm9 = vweird.f32 %v740_v52  ;;  %584 = vmatpush.msra.mxu2 %v565_v45 }
 0x318   :  { %vm282_vm11 = vmor %vm280_vm10, %vm281_vm9  ;;  %vm592_vm9 = vcmask 257024  }
 0x319   :  { %v277_v54 = vsub.f32 1.0, %v276_v53  ;;  %585 = vmatpush.msra.mxu2 %v564_v46 }
 0x31b   :  { %v278_v55 = vmul.f32 %v740_v52, %v277_v54  ;;  %586 = vmatpush.msra.mxu2 %v563_v47 }
 0x31d   :  { %v279_v56 = vadd.f32 %v740_v52, %v278_v55  ;;  %587 = vmatpush.msra.mxu2 %v562_v48 }
 0x31f   :  { %v283_v59 = vsel %vm282_vm11, %v740_v52, %v279_v56 }
 0x320   :  { %v288_v62 = vsel %vm285_vm12, %v287_v60, %v283_v59 }
 0x321   :  { %v294_v3 = vmul.f32 %v292_v2, %v288_v62 }
 0x366   :  { %v297_v61 = vpop.permute.xlu2 %296 }
 0x367   :  { %v299_v63 = vmul.f32 %v297_v61, %v288_v62 }
 0x369   :  { %301 = vrot.lane.b32.xlu2 %v299_v63, %s872_s11 }
 0x391   :  { %v970_v0 = vpop.f32.mrf.mxu2 }
 0x3c3   :  { %v302_v6 = vpop.permute.xlu2 %301 }
 0x3c4   :  { %v304_v7 = vadd.f32 %v302_v6, %v294_v3 }
 0x3c6   :  { %741 = vtanh.f32 %v304_v7  ;;  %v362_v39 = vrot.slane %v304_v7, 7 }
 0x3cc   :  { %v742_v8 = vpop.eup %741 }
 0x3cd   :  { %307 = vrot.lane.b32.xlu0 %v742_v8, %s871_s10 }
 0x43f   :  { %v308_v14 = vpop.permute.xlu0 %307 }
 0x440   :  { %v310_v15 = vmul.f32 %v308_v14, %v288_v62 }
 0x442   :  { %v312_v16 = vrot.slane %v310_v15, 1  ;;  %v451_v52 = vsel %vm86_vm0, %v935_v43, %v310_v15  ;;  %v461_v15 = vld [vmem:[#allocation6 + $0x48] sm:$0xff] }
 0x443   :  { %479 = vmatpush.msrb.mxu3 %v461_v15 }
 0x444   :  { %313 = vrot.lane.b32.xlu1 %v312_v16, %s872_s11  ;;  %v460_v16 = vld [vmem:[#allocation6 + $0x40] sm:$0xff] }
 0x445   :  { %480 = vmatpush.msrb.mxu3 %v460_v16 }
 0x4b6   :  { %v314_v17 = vpop.permute.xlu1 %313 }
 0x4b7   :  { %699 = vmatmul.msk.f32.vlgmr.msrb.gmra.mxu1 %vm126_vm8, %v314_v17  ;;  %v459_v17 = vld [vmem:[#allocation6 + $0x38] sm:$0xff] }
 0x4b8   :  { %481 = vmatpush.msrb.mxu3 %v459_v17 }
 0x534   :  { %v334_v19 = vpop.f32.mrf.mxu1 }
 0x535   :  { %v338_v21 = vrot.slane %v334_v19, 6  ;;  %v458_v19 = vld [vmem:[#allocation6 + $0x30] sm:$0xff] }
 0x536   :  { %482 = vmatpush.msrb.mxu3 %v458_v19 }
 0x537   :  { %v340_v22 = vadd.f32 %v338_v21, %v929_v20 }
 0x539   :  { %743 = vtanh.f32 %v340_v22  ;;  %v700_v24 = vmul.f32 -1.442695, %v340_v22 }
 0x53b   :  { %745 = vpow2.f32 %v700_v24 }
 0x53f   :  { %v744_v23 = vpop.eup %743 }
 0x540   :  { %366 = vrot.lane.b32.xlu2 %v744_v23, %s871_s10 }
 0x541   :  { %v746_v25 = vpop.eup %745 }
 0x542   :  { %v344_v26 = vadd.f32 1.0, %v746_v25  ;;  %v494_v25 = vld [vmem:[#allocation6 + $0x68] sm:$0xff] }
 0x543   :  { %510 = vmatpush.msra.mxu0 %v494_v25 }
 0x544   :  { %747 = vrcp.f32 %v344_v26  ;;  %v356_v32 = vand.u32 2147483648, %v344_v26  ;;  %vm350_vm14 = vweird.f32 %v344_v26  ;;  %v354_v33 = vand.u32 2147483647, %v344_v26 }
 0x546   :  { %v357_v35 = vor.u32 1.1754944e-38, %v356_v32  ;;  %vm355_vm3 = vcmp.eq.f32.partialorder %v354_v33, 8.507059e+37 }
 0x54a   :  { %v748_v27 = vpop.eup %747 }
 0x54b   :  { %v346_v28 = vmul.f32 %v748_v27, %v344_v26  ;;  %vm351_vm13 = vweird.f32 %v748_v27  ;;  %v493_v26 = vld [vmem:[#allocation6 + $0x60] sm:$0xff] }
 0x54c   :  { %vm352_vm15 = vmor %vm350_vm14, %vm351_vm13  ;;  %511 = vmatpush.msra.mxu0 %v493_v26 }
 0x54d   :  { %v347_v29 = vsub.f32 1.0, %v346_v28  ;;  %v491_v28 = vld [vmem:[#allocation6 + $0x50] sm:$0xff] }
 0x54f   :  { %v348_v30 = vmul.f32 %v748_v27, %v347_v29  ;;  %v723_v29 = vld [vmem:[#allocation6 + $0xf1] ss:$0 sm:$0xff] }
 0x551   :  { %v349_v31 = vadd.f32 %v748_v27, %v348_v30 }
 0x553   :  { %v353_v34 = vsel %vm352_vm15, %v748_v27, %v349_v31  ;;  %v492_v27 = vld [vmem:[#allocation6 + $0x58] sm:$0xff] }
 0x554   :  { %v358_v37 = vsel %vm355_vm3, %v357_v35, %v353_v34  ;;  %512 = vmatpush.msra.mxu0 %v492_v27  ;;  %v525_v34 = vld [vmem:[#allocation6 + $0xc8] sm:$0xff]  ;;  %v524_v35 = vld [vmem:[#allocation6 + $0xc0] sm:$0xff] }
 0x555   :  { %v364_v40 = vmul.f32 %v362_v39, %v358_v37  ;;  %541 = vmatpush.msra.mxu1 %v525_v34 }
 0x556   :  { %513 = vmatpush.msra.mxu0 %v491_v28 }
 0x557   :  { %542 = vmatpush.msra.mxu1 %v524_v35 }
 0x59a   :  { %v367_v36 = vpop.permute.xlu2 %366 }
 0x59b   :  { %v369_v38 = vmul.f32 %v367_v36, %v358_v37  ;;  %v523_v36 = vld [vmem:[#allocation6 + $0xb8] sm:$0xff] }
 0x59c   :  { %543 = vmatpush.msra.mxu1 %v523_v36 }
 0x59d   :  { %371 = vrot.lane.b32.xlu0 %v369_v38, %s872_s11  ;;  %v724_v38 = vld [vmem:[#allocation6 + $0xf2] ss:$0 sm:$0xff] }
 0x60f   :  { %v372_v41 = vpop.permute.xlu0 %371 }
 0x610   :  { %v374_v42 = vadd.f32 %v372_v41, %v364_v40 }
 0x612   :  { %749 = vtanh.f32 %v374_v42  ;;  %v432_v10 = vrot.slane %v374_v42, 7  ;;  %v725_v42 = vld [vmem:[#allocation6 + $0xf3] ss:$0 sm:$0xff] }
 0x618   :  { %v750_v44 = vpop.eup %749 }
 0x619   :  { %377 = vrot.lane.b32.xlu1 %v750_v44, %s871_s10 }
 0x68b   :  { %v378_v50 = vpop.permute.xlu1 %377 }
 0x68c   :  { %v380_v51 = vmul.f32 %v378_v50, %v358_v37  ;;  %v522_v37 = vld [vmem:[#allocation6 + $0xb0] sm:$0xff] }
 0x68d   :  { %544 = vmatpush.msra.mxu1 %v522_v37 }
 0x68e   :  { %v382_v53 = vrot.slane %v380_v51, 2  ;;  %v452_v54 = vsel %vm88_vm1, %v451_v52, %v380_v51 }
 0x690   :  { %383 = vrot.lane.b32.xlu2 %v382_v53, %s872_s11 }
 0x6ea   :  { %v384_v55 = vpop.permute.xlu2 %383 }
 0x6eb   :  { %701 = vmatmul.msk.f32.vlgmr.msrb.gmra.mxu2 %vm126_vm8, %v384_v55 }
 0x76e   :  { %v404_v1 = vpop.f32.mrf.mxu2 }
 0x76f   :  { %v408_v56 = vrot.slane %v404_v1, 5  ;;  %v726_v1 = vld [vmem:[#allocation6 + $0xf4] ss:$0 sm:$0xff] }
 0x771   :  { %v410_v4 = vadd.f32 %v408_v56, %v929_v20 }
 0x773   :  { %751 = vtanh.f32 %v410_v4  ;;  %v702_v57 = vmul.f32 -1.442695, %v410_v4 }
 0x775   :  { %753 = vpow2.f32 %v702_v57 }
 0x779   :  { %v752_v5 = vpop.eup %751 }
 0x77a   :  { %436 = vrot.lane.b32.xlu0 %v752_v5, %s871_s10 }
 0x77b   :  { %v754_v43 = vpop.eup %753 }
 0x77c   :  { %v414_v58 = vadd.f32 1.0, %v754_v43 }
 0x77e   :  { %755 = vrcp.f32 %v414_v58  ;;  %v426_v2 = vand.u32 2147483648, %v414_v58  ;;  %vm420_vm1 = vweird.f32 %v414_v58  ;;  %v424_v3 = vand.u32 2147483647, %v414_v58 }
 0x780   :  { %v427_v6 = vor.u32 1.1754944e-38, %v426_v2  ;;  %vm425_vm5 = vcmp.eq.f32.partialorder %v424_v3, 8.507059e+37 }
 0x784   :  { %v756_v59 = vpop.eup %755 }
 0x785   :  { %v416_v60 = vmul.f32 %v756_v59, %v414_v58  ;;  %vm421_vm0 = vweird.f32 %v756_v59 }
 0x786   :  { %vm422_vm4 = vmor %vm420_vm1, %vm421_vm0 }
 0x787   :  { %v417_v61 = vsub.f32 1.0, %v416_v60 }
 0x789   :  { %v418_v62 = vmul.f32 %v756_v59, %v417_v61 }
 0x78b   :  { %v419_v63 = vadd.f32 %v756_v59, %v418_v62 }
 0x78d   :  { %v423_v20 = vsel %vm422_vm4, %v756_v59, %v419_v63 }
 0x78e   :  { %v428_v8 = vsel %vm425_vm5, %v427_v6, %v423_v20 }
 0x78f   :  { %v434_v11 = vmul.f32 %v432_v10, %v428_v8 }
 0x7ec   :  { %v437_v7 = vpop.permute.xlu0 %436 }
 0x7ed   :  { %v439_v9 = vmul.f32 %v437_v7, %v428_v8 }
 0x7ef   :  { %441 = vrot.lane.b32.xlu1 %v439_v9, %s872_s11 }
 0x861   :  { %v442_v12 = vpop.permute.xlu1 %441 }
 0x862   :  { %v444_v13 = vadd.f32 %v442_v12, %v434_v11 }
 0x864   :  { %757 = vtanh.f32 %v444_v13 }
 0x86a   :  { %v758_v14 = vpop.eup %757 }
 0x86b   :  { %447 = vrot.lane.b32.xlu2 %v758_v14, %s871_s10 }
 0x873   :  { %557 = vrot.lane.b32.xlu2 %v725_v42, %s872_s11 }
 0x8c5   :  { %v448_v21 = vpop.permute.xlu2 %447 }
 0x8c6   :  { %v450_v22 = vmul.f32 %v448_v21, %v428_v8 }
 0x8c8   :  { %v453_v23 = vsel %vm90_vm2, %v452_v54, %v450_v22 }
 0x8c9   :  { %463 = vrot.lane.b32.xlu0 %v453_v23, %s872_s11 }
 0x8cd   :  { %v558_v51 = vpop.permute.xlu2 %557 }
 0x93b   :  { %v464_v24 = vpop.permute.xlu0 %463 }
 0x93c   :  { %703 = vmatmul.msk.f32.vlgmr.msrb.gmra.mxu3 %vm126_vm8, %v464_v24 }
 0x9bf   :  { %v484_v30 = vpop.f32.mrf.mxu3 }
 0x9c0   :  { %v487_v31 = vadd.f32 %v484_v30, %v954_v18 }
 0x9c2   :  { %v489_v32 = vadd.f32 %v723_v29, %v487_v31 }
 0x9c4   :  { %759 = vtanh.f32 %v489_v32 }
 0x9ca   :  { %v760_v33 = vpop.eup %759 }
 0x9cb   :  { %704 = vmatmul.msk.f32.vlgmr.msra.gmra.mxu0 %vm126_vm8, %v760_v33 }
 0xa48   :  { %v515_v39 = vpop.f32.mrf.mxu0 }
 0xa49   :  { %v518_v40 = vadd.f32 %v515_v39, %v970_v0  ;;  %v549_v49 = vadd.f32 %v515_v39, %v484_v30  ;;  %v874_v0 = vmov 32  }
 0xa4a   :  { %719 = vset.pattern.permute.xlu1 %v874_v0  ;;  %720 = vset.pattern.permute.xlu2 %v874_v0 }
 0xa4b   :  { %v520_v41 = vadd.f32 %v724_v38, %v518_v40  ;;  %721 = vset.pattern.permute.xlu0 %v874_v0 }
 0xa4d   :  { %761 = vtanh.f32 %v520_v41 }
 0xa53   :  { %v982_v18 = vpop.eup %761 }
 0xa54   :  { %705 = vmatmul.msk.f32.vlgmr.msra.gmra.mxu1 %vm126_vm8, %v982_v18 }
 0xad1   :  { %v546_v44 = vpop.f32.mrf.mxu1 }
 0xad2   :  { %551 = vrot.lane.b32.xlu1 %v546_v44, %s872_s11 }
 0xb44   :  { %v552_v50 = vpop.permute.xlu1 %551 }
 0xb45   :  { %v554_v52 = vadd.f32 %v552_v50, %v549_v49 }
 0xb47   :  { %v560_v53 = vadd.f32 %v558_v51, %v554_v52 }
 0xb49   :  { %763 = vtanh.f32 %v560_v53 }
 0xb4f   :  { %v764_v54 = vpop.eup %763 }
 0xb50   :  { %568 = vrot.lane.b32.xlu0 %v764_v54, %s873_s2 }
 0xbc2   :  { %v569_v55 = vpop.permute.xlu0 %568 }
 0xbc3   :  { %706 = vmatmul.msk.f32.vlgmr.msra.gmra.mxu2 %vm126_vm8, %v569_v55 }
 0xc46   :  { %v589_v56 = vpop.f32.mrf.mxu2 }
 0xc47   :  { %v590_v4 = vadd.f32 %v726_v1, %v589_v56 }
 0xc49   :  { %v707_v5 = vmul.f32 -1.442695, %v590_v4  ;;  %v593_v8 = vsel %vm592_vm9, %v590_v4, -inf }
 0xc4a   :  { %v594_v9 = vrot.slane %v593_v8, 4 }
 0xc4b   :  { %765 = vpow2.f32 %v707_v5 }
 0xc4c   :  { %v595_v10 = vmax.f32 %v593_v8, %v594_v9 }
 0xc4e   :  { %v596_v11 = vrot.slane %v595_v10, 2 }
 0xc50   :  { %v597_v12 = vmax.f32 %v595_v10, %v596_v11 }
 0xc51   :  { %v766_v57 = vpop.eup %765 }
 0xc52   :  { %v628_v43 = vadd.f32 1.0, %v766_v57  ;;  %v598_v13 = vrot.slane %v597_v12, 1 }
 0xc54   :  { %767 = vrcp.f32 %v628_v43  ;;  %v640_v61 = vand.u32 2147483648, %v628_v43  ;;  %v638_v63 = vand.u32 2147483647, %v628_v43  ;;  %vm634_vm6 = vweird.f32 %v628_v43 }
 0xc55   :  { %v599_v14 = vmax.f32 %v597_v12, %v598_v13 }
 0xc56   :  { %v641_v3 = vor.u32 1.1754944e-38, %v640_v61  ;;  %vm639_vm8 = vcmp.eq.f32.partialorder %v638_v63, 8.507059e+37 }
 0xc57   :  { %v600_v15 = vsub.f32 %v590_v4, %v599_v14 }
 0xc59   :  { %v601_v16 = vmul.f32 1.442695, %v600_v15 }
 0xc5a   :  { %v768_v58 = vpop.eup %767 }
 0xc5b   :  { %v630_v59 = vmul.f32 %v768_v58, %v628_v43  ;;  %vm635_vm2 = vweird.f32 %v768_v58  ;;  %769 = vpow2.f32 %v601_v16 }
 0xc5c   :  { %vm636_vm7 = vmor %vm634_vm6, %vm635_vm2 }
 0xc5d   :  { %v631_v60 = vsub.f32 1.0, %v630_v59 }
 0xc5f   :  { %v632_v62 = vmul.f32 %v768_v58, %v631_v60 }
 0xc61   :  { %v633_v2 = vadd.f32 %v768_v58, %v632_v62  ;;  %v770_v17 = vpop.eup %769 }
 0xc62   :  { %v603_v19 = vsel %vm592_vm9, %v770_v17, 0.0 }
 0xc63   :  { %v637_v20 = vsel %vm636_vm7, %v768_v58, %v633_v2  ;;  %v604_v21 = vrot.slane %v603_v19, 4 }
 0xc64   :  { %v642_v6 = vsel %vm639_vm8, %v641_v3, %v637_v20 }
 0xc65   :  { %646 = vperm.xlu1 %719, %v642_v6   ;;  %v650_v7 = vsub.f32 1.0, %v642_v6  ;;  %v605_v22 = vadd.f32 %v604_v21, %v603_v19 }
 0xc67   :  { %653 = vperm.xlu2 %720, %v650_v7   ;;  %v606_v23 = vrot.slane %v605_v22, 2 }
 0xc69   :  { %v607_v24 = vadd.f32 %v606_v23, %v605_v22 }
 0xc6b   :  { %v608_v25 = vrot.slane %v607_v24, 1 }
 0xc6d   :  { %v609_v26 = vadd.f32 %v608_v25, %v607_v24 }
 0xc6f   :  { %771 = vrcp.f32 %v609_v26  ;;  %v621_v32 = vand.u32 2147483648, %v609_v26  ;;  %vm615_vm11 = vweird.f32 %v609_v26  ;;  %v619_v33 = vand.u32 2147483647, %v609_v26 }
 0xc71   :  { %v622_v35 = vor.u32 1.1754944e-38, %v621_v32  ;;  %vm620_vm13 = vcmp.eq.f32.partialorder %v619_v33, 8.507059e+37 }
 0xc75   :  { %v772_v27 = vpop.eup %771 }
 0xc76   :  { %v611_v28 = vmul.f32 %v772_v27, %v609_v26  ;;  %vm616_vm10 = vweird.f32 %v772_v27 }
 0xc77   :  { %vm617_vm12 = vmor %vm615_vm11, %vm616_vm10 }
 0xc78   :  { %v612_v29 = vsub.f32 1.0, %v611_v28 }
 0xc7a   :  { %v613_v30 = vmul.f32 %v772_v27, %v612_v29 }
 0xc7c   :  { %v614_v31 = vadd.f32 %v772_v27, %v613_v30 }
 0xc7e   :  { %v618_v34 = vsel %vm617_vm12, %v772_v27, %v614_v31 }
 0xc7f   :  { %v623_v36 = vsel %vm620_vm13, %v622_v35, %v618_v34 }
 0xc80   :  { %v624_v38 = vmul.f32 %v770_v17, %v623_v36 }
 0xcc1   :  { %v654_v37 = vpop.permute.xlu2 %653 }
 0xcc2   :  { %v656_v40 = vmul.f32 %v654_v37, %v624_v38 }
 0xcd7   :  { %v647_v39 = vpop.permute.xlu1 %646 }
 0xcd8   :  { %v649_v41 = vmul.f32 %v982_v18, %v647_v39 }
 0xcda   :  { %v657_v42 = vadd.f32 %v656_v40, %v649_v41 }
 0xcdc   :  { %658 = vst.msk [vmem:[#allocation9] sm:$0xf] %vm592_vm9, %v657_v42 }
 0xcdd   :  { %669 = dma.vmem_to_hbm [thread:$0]  %s665_s15, 64, %s667_s18, [#allocation4]  }
 0xcde   :  { %863 = dma.done.wait [#allocation4], 64  }
 0xcdf   :  { %864 = vsyncadd [#allocation4], 4294967232 }
 0xce0   :  { %674 = vsyncpa [#allocation3], 1 }
 0xce1   :  { %675 = vsyncpa [#allocation8], 1 }
 0xce2   :  { %676 = vsyncpa [#allocation4], 1 }
 0xce3   :  { %677 = vsyncpa [#allocation5], 1 }

</bundles_post_ra>
